<compile_context>
chip_gen: v7x
topology: tpu7x:2x2x1
jax: 0.10.0
libtpu: 0.0.40
codegen_flags: <defaults>
</compile_context>

<pallas_src>
import jax
import jax.numpy as jnp
from jax.experimental import pallas as pl
from jax.experimental.pallas import tpu as pltpu

GAMMA = 2.0
BETA = 0.25
_LANES = 128
# 1024 rows x 128 lanes x 4 B = 512 KiB per buffer; 3 arrays x 2 buffers = 3 MiB
# of VMEM — comfortably under the scoped default on v5e/v6e/v7x while big enough
# to hide per-step overhead (~85%+ of HBM roofline for elementwise kernels).
_DEFAULT_TILE_ROWS = 1024


def _focal_kernel(pred_ref, tgt_ref, out_ref):
    pred = pred_ref[...].astype(jnp.float32)
    tgt = tgt_ref[...].astype(jnp.float32)

    p = jax.nn.sigmoid(pred)                      # EUP
    # 1 - pt = tgt*(1-p) + (1-tgt)*p
    one_m_pt = tgt * (1.0 - p) + (1.0 - tgt) * p
    # log(pt) via log-sigmoid: numerically safe when the sigmoid saturates.
    log_pt = tgt * jax.nn.log_sigmoid(pred) + (1.0 - tgt) * jax.nn.log_sigmoid(-pred)
    # alpha_t = BETA*tgt + (1-BETA)*(1-tgt)  ==  (2*BETA-1)*tgt + (1-BETA)
    alpha_t = (2.0 * BETA - 1.0) * tgt + (1.0 - BETA)
    # (1 - pt)**GAMMA with GAMMA == 2.0  ->  explicit square (VPU mul, no EUP pow)
    focal = one_m_pt * one_m_pt

    loss = -alpha_t * focal * log_pt
    out_ref[...] = loss.astype(out_ref.dtype)


def focal_loss(pred, target, *, tile_rows=_DEFAULT_TILE_ROWS):
    """Elementwise sigmoid focal loss. pred/target: same shape (e.g. NCHW)."""
    assert pred.shape == target.shape
    orig_shape = pred.shape
    out_dtype = pred.dtype
    total = pred.size

    pred_flat = pred.reshape(-1)
    tgt_flat = target.reshape(-1)

    pad = (-total) % _LANES
    if pad:
        # TODO(synk): rare non-multiple-of-128 element counts take one small flat
        # pad; typical NCHW shapes hit the pad-free path.
        pred_flat = jnp.pad(pred_flat, (0, pad))
        tgt_flat = jnp.pad(tgt_flat, (0, pad))

    rows = pred_flat.size // _LANES
    pred2 = pred_flat.reshape(rows, _LANES)   # free row-major view, lane-dense
    tgt2 = tgt_flat.reshape(rows, _LANES)

    # Row-tile: multiple of 8 (sublane), never larger than needed.
    tile_r = min(tile_rows, ((rows + 7) // 8) * 8)
    grid = (pl.cdiv(rows, tile_r),)

    out2 = pl.pallas_call(
        _focal_kernel,
        out_shape=jax.ShapeDtypeStruct((rows, _LANES), out_dtype),
        grid=grid,
        in_specs=[
            pl.BlockSpec((tile_r, _LANES), lambda i: (i, 0)),
            pl.BlockSpec((tile_r, _LANES), lambda i: (i, 0)),
        ],
        out_specs=pl.BlockSpec((tile_r, _LANES), lambda i: (i, 0)),
        compiler_params=pltpu.CompilerParams(
            dimension_semantics=("parallel",),  # shard rows across TCs on v7x
        ),
    )(pred2, tgt2)

    out_flat = out2.reshape(-1)
    if pad:
        out_flat = out_flat[:total]
    return out_flat.reshape(orig_shape)


if __name__ == "__main__":
    key = jax.random.PRNGKey(0)
    kp, kt = jax.random.split(key)

    B, C, H, W = 2, 4, 16, 16  # NCHW
    pred = jax.random.normal(kp, (B, C, H, W), dtype=jnp.float32)
    target = (jax.random.uniform(kt, (B, C, H, W)) > 0.5).astype(jnp.float32)

    loss = focal_loss(pred, target)
    jax.block_until_ready(loss)

    # plain-JAX reference (canonical sigmoid focal loss)
    p = jax.nn.sigmoid(pred)
    pt = p * target + (1 - p) * (1 - target)
    alpha_t = BETA * target + (1 - BETA) * (1 - target)
    ref = -alpha_t * (1 - pt) ** GAMMA * jnp.log(pt)

    assert loss.shape == pred.shape
    assert loss.dtype == pred.dtype
    assert jnp.allclose(loss, ref, atol=1e-5, rtol=1e-5)

    print("KERNEL_OK")
</pallas_src>

<mosaic_0001>
module attributes {stable_mosaic.version = 11 : i64} {
  func.func @_focal_kernel(%arg0: i32, %arg1: memref<16x128xf32, #tpu.memory_space<vmem>>, %arg2: memref<16x128xf32, #tpu.memory_space<vmem>>, %arg3: memref<16x128xf32, #tpu.memory_space<vmem>>) attributes {dimension_semantics = [#tpu.dimension_semantics<parallel>], iteration_bounds = array<i64: 1>, scalar_prefetch = 0 : i64, scratch_operands = 0 : i64, tpu.core_type = #tpu.core_type<tc>, window_params = [{transform_indices = @transform_0, window_bounds = array<i64: 16, 128>}, {transform_indices = @transform_1, window_bounds = array<i64: 16, 128>}, {transform_indices = @transform_2, window_bounds = array<i64: 16, 128>}]} {
    %c0 = arith.constant 0 : index
    %c0_0 = arith.constant 0 : index
    %0 = vector.load %arg1[%c0, %c0_0] : memref<16x128xf32, #tpu.memory_space<vmem>>, vector<16x128xf32>
    %c0_1 = arith.constant 0 : index
    %c0_2 = arith.constant 0 : index
    %1 = vector.load %arg2[%c0_1, %c0_2] : memref<16x128xf32, #tpu.memory_space<vmem>>, vector<16x128xf32>
    %2 = arith.negf %0 : vector<16x128xf32>
    %3 = math.exp %2 : vector<16x128xf32>
    %cst = arith.constant 1.000000e+00 : f32
    %4 = vector.broadcast %cst : f32 to vector<16x128xf32>
    %5 = arith.addf %4, %3 : vector<16x128xf32>
    %6 = arith.divf %4, %5 : vector<16x128xf32>
    %cst_3 = arith.constant 1.000000e+00 : f32
    %7 = vector.broadcast %cst_3 : f32 to vector<16x128xf32>
    %8 = arith.subf %7, %6 : vector<16x128xf32>
    %9 = arith.mulf %1, %8 : vector<16x128xf32>
    %cst_4 = arith.constant 1.000000e+00 : f32
    %10 = vector.broadcast %cst_4 : f32 to vector<16x128xf32>
    %11 = arith.subf %10, %1 : vector<16x128xf32>
    %12 = arith.mulf %11, %6 : vector<16x128xf32>
    %13 = arith.addf %9, %12 : vector<16x128xf32>
    %cst_5 = arith.constant 0.000000e+00 : f32
    %14 = vector.broadcast %cst_5 : f32 to vector<16x128xf32>
    %15 = arith.subf %14, %0 : vector<16x128xf32>
    %cst_6 = arith.constant 0.000000e+00 : f32
    %16 = vector.broadcast %cst_6 : f32 to vector<16x128xf32>
    %17 = arith.maximumf %15, %16 : vector<16x128xf32>
    %18 = vector.broadcast %cst_6 : f32 to vector<16x128xf32>
    %19 = arith.subf %15, %18 : vector<16x128xf32>
    %20 = arith.cmpf one, %19, %19 : vector<16x128xf32>
    %21 = vector.broadcast %cst_6 : f32 to vector<16x128xf32>
    %22 = arith.addf %15, %21 : vector<16x128xf32>
    %23 = math.absf %19 : vector<16x128xf32>
    %cst_7 = arith.constant 0.000000e+00 : f32
    %24 = vector.broadcast %cst_7 : f32 to vector<16x128xf32>
    %25 = arith.subf %24, %23 : vector<16x128xf32>
    %26 = math.exp %25 : vector<16x128xf32>
    %27 = math.log1p %26 : vector<16x128xf32>
    %28 = arith.addf %17, %27 : vector<16x128xf32>
    %29 = arith.select %20, %22, %28 : vector<16x128xi1>, vector<16x128xf32>
    %cst_8 = arith.constant 0.000000e+00 : f32
    %30 = vector.broadcast %cst_8 : f32 to vector<16x128xf32>
    %31 = arith.subf %30, %29 : vector<16x128xf32>
    %32 = arith.mulf %1, %31 : vector<16x128xf32>
    %cst_9 = arith.constant 1.000000e+00 : f32
    %33 = vector.broadcast %cst_9 : f32 to vector<16x128xf32>
    %34 = arith.subf %33, %1 : vector<16x128xf32>
    %cst_10 = arith.constant 0.000000e+00 : f32
    %35 = vector.broadcast %cst_10 : f32 to vector<16x128xf32>
    %36 = arith.subf %35, %0 : vector<16x128xf32>
    %cst_11 = arith.constant 0.000000e+00 : f32
    %37 = vector.broadcast %cst_11 : f32 to vector<16x128xf32>
    %38 = arith.subf %37, %36 : vector<16x128xf32>
    %cst_12 = arith.constant 0.000000e+00 : f32
    %39 = vector.broadcast %cst_12 : f32 to vector<16x128xf32>
    %40 = arith.maximumf %38, %39 : vector<16x128xf32>
    %41 = vector.broadcast %cst_12 : f32 to vector<16x128xf32>
    %42 = arith.subf %38, %41 : vector<16x128xf32>
    %43 = arith.cmpf one, %42, %42 : vector<16x128xf32>
    %44 = vector.broadcast %cst_12 : f32 to vector<16x128xf32>
    %45 = arith.addf %38, %44 : vector<16x128xf32>
    %46 = math.absf %42 : vector<16x128xf32>
    %cst_13 = arith.constant 0.000000e+00 : f32
    %47 = vector.broadcast %cst_13 : f32 to vector<16x128xf32>
    %48 = arith.subf %47, %46 : vector<16x128xf32>
    %49 = math.exp %48 : vector<16x128xf32>
    %50 = math.log1p %49 : vector<16x128xf32>
    %51 = arith.addf %40, %50 : vector<16x128xf32>
    %52 = arith.select %43, %45, %51 : vector<16x128xi1>, vector<16x128xf32>
    %cst_14 = arith.constant 0.000000e+00 : f32
    %53 = vector.broadcast %cst_14 : f32 to vector<16x128xf32>
    %54 = arith.subf %53, %52 : vector<16x128xf32>
    %55 = arith.mulf %34, %54 : vector<16x128xf32>
    %56 = arith.addf %32, %55 : vector<16x128xf32>
    %cst_15 = arith.constant -5.000000e-01 : f32
    %57 = vector.broadcast %cst_15 : f32 to vector<16x128xf32>
    %58 = arith.mulf %57, %1 : vector<16x128xf32>
    %cst_16 = arith.constant 7.500000e-01 : f32
    %59 = vector.broadcast %cst_16 : f32 to vector<16x128xf32>
    %60 = arith.addf %58, %59 : vector<16x128xf32>
    %61 = arith.mulf %13, %13 : vector<16x128xf32>
    %cst_17 = arith.constant 0.000000e+00 : f32
    %62 = vector.broadcast %cst_17 : f32 to vector<16x128xf32>
    %63 = arith.subf %62, %60 : vector<16x128xf32>
    %64 = arith.mulf %63, %61 : vector<16x128xf32>
    %65 = arith.mulf %64, %56 : vector<16x128xf32>
    %c0_18 = arith.constant 0 : index
    %c0_19 = arith.constant 0 : index
    %66 = vector.load %arg3[%c0_18, %c0_19] : memref<16x128xf32, #tpu.memory_space<vmem>>, vector<16x128xf32>
    tpu.vector_store %arg3[%c0_18, %c0_19], %65 {strides = array<i32>} : memref<16x128xf32, #tpu.memory_space<vmem>>, vector<16x128xf32>,
    return
  }
  func.func @transform_0(%arg0: i32) -> (i32, i32) {
    %c0_i32 = arith.constant 0 : i32
    %c0_i32_0 = arith.constant 0 : i32
    return %arg0, %c0_i32 : i32, i32
  }
  func.func @transform_1(%arg0: i32) -> (i32, i32) {
    %c0_i32 = arith.constant 0 : i32
    %c0_i32_0 = arith.constant 0 : i32
    return %arg0, %c0_i32 : i32, i32
  }
  func.func @transform_2(%arg0: i32) -> (i32, i32) {
    %c0_i32 = arith.constant 0 : i32
    %c0_i32_0 = arith.constant 0 : i32
    return %arg0, %c0_i32 : i32, i32
  }
}

</mosaic_0001>

<bundles_post_ra>
// kernel: tpu_custom_call.1
= control target key start
LH: loop header
LB: loop body
LE: loop exit
PB: predicated region body
PF: predicated region fallthrough
CT: control target
= control target key end

     0   :  { %7 = vsyncpa [#allocation3], 0  ;;  %s429_s0 = inlined_call_operand.hbm [shape: f32[16,128], index: 0, kind: input, shape index: {}]   ;;  %s430_s1 = inlined_call_operand.hbm [shape: f32[16,128], index: 1, kind: input, shape index: {}]   ;;  %s431_s2 = inlined_call_operand.hbm [shape: f32[16,128], index: 2, kind: output, shape index: {}]  }
   0x1   :  { %8 = vsyncpa [#allocation6], 0 }
   0x2   :  { %9 = vsyncpa [#allocation4], 0  ;;  %s287_s9 = smov [#allocation2]   ;;  %s215_s13 = scalar_lea.hbm %s429_s0, 256 }
   0x3   :  { %s15_s10 = sshll.u32 %s287_s9, 4  ;;  %p216_p0 = scmp.ne.s32.totalorder %s429_s0, %s215_s13  ;;  %s16_s10 = int_to_ptr.vmem [resolvable:$true] %s15_s10 }
   0x4   :  { %p219_p1 = scmp.lt.u32.totalorder %s215_s13, %s429_s0 }
   0x6   :  { %p221_p2 = pnand %p219_p1, %p216_p0 }
   0x8   :  { %224 = shalt.err (!%p221_p2)
}
   0x9   :  { %s225_s18 = scalar_lea.vmem %s16_s10, 256  ;;  %p230_p4 = scmp.lt.s32.totalorder %s16_s10, %s16_s10 }
   0xa   :  { %p226_p3 = scmp.ne.s32.totalorder %s16_s10, %s225_s18  ;;  %p231_p5 = scmp.lt.s32.totalorder %s225_s18, %s225_s18 }
   0xc   :  { %p232_p6 = por %p231_p5, %p230_p4 }
   0xe   :  { %p233_p7 = pnand %p232_p6, %p226_p3 }
  0x10   :  { %236 = shalt.err (!%p233_p7)
}
  0x11   :  { %s288_s19 = smov 128   ;;  %s289_s20 = smov 8  }
  0x12   :  { %21 = dma.hbm_to_vmem [thread:$0]  %s429_s0, 256, %s16_s10, [#allocation3], %s288_s19, %s288_s19, %s289_s20  }
  0x13   :  { %s290_s23 = smov [#allocation5]   ;;  %s237_s27 = scalar_lea.hbm %s430_s1, 256 }
  0x14   :  { %s27_s24 = sshll.u32 %s290_s23, 4  ;;  %p238_p8 = scmp.ne.s32.totalorder %s430_s1, %s237_s27  ;;  %s28_s24 = int_to_ptr.vmem [resolvable:$true] %s27_s24 }
  0x15   :  { %p241_p9 = scmp.lt.u32.totalorder %s237_s27, %s430_s1 }
  0x17   :  { %p243_p10 = pnand %p241_p9, %p238_p8 }
  0x19   :  { %246 = shalt.err (!%p243_p10)
}
  0x1a   :  { %s247_s4 = scalar_lea.vmem %s28_s24, 256  ;;  %p252_p12 = scmp.lt.s32.totalorder %s28_s24, %s28_s24 }
  0x1b   :  { %p248_p11 = scmp.ne.s32.totalorder %s28_s24, %s247_s4  ;;  %p253_p13 = scmp.lt.s32.totalorder %s247_s4, %s247_s4 }
  0x1d   :  { %p254_p0 = por %p253_p13, %p252_p12 }
  0x1f   :  { %p255_p1 = pnand %p254_p0, %p248_p11 }
  0x21   :  { %258 = shalt.err (!%p255_p1)
}
  0x22   :  { %33 = dma.hbm_to_vmem [thread:$0]  %s430_s1, 256, %s28_s24, [#allocation6], %s288_s19, %s288_s19, %s289_s20  }
  0x23   :  { %281 = dma.done.wait [#allocation3], 256  }
  0x24   :  { %282 = vsyncadd [#allocation3], 4294967040 }
  0x25   :  { %283 = dma.done.wait [#allocation6], 256  }
  0x26   :  { %284 = vsyncadd [#allocation6], 4294967040  ;;  %v40_v0 = vld [vmem:[#allocation2] sm:$0xff]  ;;  %v41_v1 = vld [vmem:[#allocation2 + $0x8] sm:$0xff]  ;;  %s291_s1 = smov [#allocation7]  }
  0x27   :  { %v184_v2 = vmul.f32 -1.442695, %v40_v0  ;;  %v337_v3 = vsub.f32 0.0, %v40_v0  ;;  %v185_v4 = vmul.f32 -1.442695, %v41_v1  ;;  %v339_v5 = vsub.f32 0.0, %v41_v1 }
  0x28   :  { %v351_v32 = vld [vmem:[#allocation5] sm:$0xff]  ;;  %v353_v33 = vld [vmem:[#allocation5 + $0x8] sm:$0xff]  ;;  %s171_s6 = sshll.u32 %s291_s1, 4  ;;  %s172_s6 = int_to_ptr.vmem [resolvable:$true] %s171_s6 }
  0x29   :  { %191 = vpow2.f32 %v184_v2  ;;  %v74_v6 = vand.u32 2147483647, %v337_v3  ;;  %v343_v7 = vsub.f32 0.0, %v337_v3  ;;  %v75_v9 = vand.u32 2147483647, %v339_v5  ;;  %s259_s7 = scalar_lea.vmem %s172_s6, 256  ;;  %p264_p3 = scmp.lt.s32.totalorder %s172_s6, %s172_s6 }
  0x2a   :  { %193 = vpow2.f32 %v185_v4  ;;  %v347_v10 = vsub.f32 0.0, %v339_v5  ;;  %v60_v38 = vsub.f32 1.0, %v351_v32  ;;  %v152_v40 = vmul.f32 -0.5, %v351_v32  ;;  %p260_p2 = scmp.ne.s32.totalorder %s172_s6, %s259_s7  ;;  %p265_p4 = scmp.lt.s32.totalorder %s259_s7, %s259_s7 }
  0x2b   :  { %v76_v8 = vsub.f32 0.0, %v74_v6  ;;  %v116_v11 = vand.u32 2147483647, %v343_v7  ;;  %v77_v13 = vsub.f32 0.0, %v75_v9  ;;  %v61_v44 = vsub.f32 1.0, %v353_v33 }
  0x2c   :  { %v117_v15 = vand.u32 2147483647, %v347_v10  ;;  %v68_v45 = vmax.f32 %v337_v3, 0.0  ;;  %v153_v48 = vmul.f32 -0.5, %v353_v33  ;;  %vm70_vm0 = vcmp.ne.f32.partialorder %v337_v3, %v337_v3  ;;  %p266_p5 = por %p265_p4, %p264_p3 }
  0x2d   :  { %v78_v12 = vmul.f32 1.442695, %v76_v8  ;;  %v118_v14 = vsub.f32 0.0, %v116_v11  ;;  %v80_v16 = vmul.f32 1.442695, %v77_v13  ;;  %v154_v53 = vadd.f32 0.75, %v152_v40 }
  0x2e   :  { %v119_v18 = vsub.f32 0.0, %v117_v15  ;;  %v69_v55 = vmax.f32 %v339_v5, 0.0  ;;  %vm71_vm2 = vcmp.ne.f32.partialorder %v339_v5, %v339_v5  ;;  %v110_v61 = vmax.f32 %v343_v7, 0.0  ;;  %p267_p6 = pnand %p266_p5, %p260_p2 }
  0x2f   :  { %195 = vpow2.f32 %v78_v12  ;;  %v120_v17 = vmul.f32 1.442695, %v118_v14  ;;  %vm112_vm5 = vcmp.ne.f32.partialorder %v343_v7, %v343_v7  ;;  %vm113_vm7 = vcmp.ne.f32.partialorder %v347_v10, %v347_v10 }
  0x30   :  { %197 = vpow2.f32 %v80_v16  ;;  %v122_v19 = vmul.f32 1.442695, %v119_v18  ;;  %v111_v18 = vmax.f32 %v347_v10, 0.0 }
  0x31   :  { %199 = vpow2.f32 %v120_v17 }
  0x32   :  { %201 = vpow2.f32 %v122_v19 }
  0x33   :  { %v192_v20 = vpop.eup %191 }
  0x34   :  { %v194_v21 = vpop.eup %193  ;;  %v50_v22 = vadd.f32 1.0, %v192_v20  ;;  %v155_v20 = vadd.f32 0.75, %v153_v48 }
  0x35   :  { %v51_v23 = vadd.f32 1.0, %v194_v21 }
  0x36   :  { %203 = vrcp.f32 %v50_v22 }
  0x37   :  { %205 = vrcp.f32 %v51_v23 }
  0x39   :  { %v196_v24 = vpop.eup %195 }
  0x3a   :  { %v82_v25 = vadd.f32 1.0, %v196_v24  ;;  %v198_v26 = vpop.eup %197  ;;  %v85_v29 = vmul.f32 -0.5, %v196_v24  ;;  %v88_v43 = vand.u32 2147483647, %v196_v24 }
  0x3b   :  { %v200_v27 = vpop.eup %199  ;;  %v91_v28 = vadd.f32 1.0, %v198_v26  ;;  %v94_v34 = vmul.f32 -0.5, %v198_v26  ;;  %v97_v51 = vand.u32 2147483647, %v198_v26 }
  0x3c   :  { %207 = vlog2.f32 %v82_v25  ;;  %v124_v30 = vadd.f32 1.0, %v200_v27  ;;  %v202_v31 = vpop.eup %201  ;;  %v127_v36 = vmul.f32 -0.5, %v200_v27  ;;  %v86_v39 = vadd.f32 1.0, %v85_v29 }
  0x3d   :  { %209 = vlog2.f32 %v91_v28  ;;  %v133_v37 = vadd.f32 1.0, %v202_v31  ;;  %v95_v46 = vadd.f32 1.0, %v94_v34  ;;  %v136_v47 = vmul.f32 -0.5, %v202_v31 }
  0x3e   :  { %211 = vlog2.f32 %v124_v30  ;;  %v128_v49 = vadd.f32 1.0, %v127_v36  ;;  %v130_v50 = vand.u32 2147483647, %v200_v27  ;;  %v87_v52 = vmul.f32 %v196_v24, %v86_v39 }
  0x3f   :  { %213 = vlog2.f32 %v133_v37  ;;  %vm366_vm1 = vcmp.lt.f32.partialorder %v88_v43, 0.0004427343  ;;  %v96_v62 = vmul.f32 %v198_v26, %v95_v46  ;;  %v137_v63 = vadd.f32 1.0, %v136_v47 }
  0x40   :  { %v204_v35 = vpop.eup %203  ;;  %v129_v1 = vmul.f32 %v200_v27, %v128_v49  ;;  %vm373_vm3 = vcmp.lt.f32.partialorder %v130_v50, 0.0004427343  ;;  %vm377_vm4 = vcmp.lt.f32.partialorder %v97_v51, 0.0004427343  ;;  %v139_v6 = vand.u32 2147483647, %v202_v31 }
  0x41   :  { %v206_v41 = vpop.eup %205  ;;  %v56_v42 = vsub.f32 1.0, %v204_v35  ;;  %v62_v58 = vmul.f32 %v204_v35, %v60_v38  ;;  %v138_v19 = vmul.f32 %v202_v31, %v137_v63  ;;  %v158_v30 = vsub.f32 0.0, %v154_v53 }
  0x42   :  { %v57_v54 = vsub.f32 1.0, %v206_v41  ;;  %v63_v12 = vmul.f32 %v206_v41, %v61_v44  ;;  %vm140_vm6 = vcmp.lt.f32.partialorder %v139_v6, 0.0004427343  ;;  %v159_v41 = vsub.f32 0.0, %v155_v20 }
  0x43   :  { %v58_v57 = vmul.f32 %v56_v42, %v351_v32 }
  0x44   :  { %v59_v11 = vmul.f32 %v57_v54, %v353_v33 }
  0x45   :  { %v64_v14 = vadd.f32 %v62_v58, %v58_v57 }
  0x46   :  { %v208_v56 = vpop.eup %207  ;;  %v65_v27 = vadd.f32 %v63_v12, %v59_v11 }
  0x47   :  { %v84_v60 = vmul.f32 0.6931472, %v208_v56  ;;  %v210_v0 = vpop.eup %209  ;;  %v156_v29 = vmul.f32 %v64_v14, %v64_v14 }
  0x48   :  { %v212_v8 = vpop.eup %211  ;;  %v93_v13 = vmul.f32 0.6931472, %v210_v0  ;;  %v157_v40 = vmul.f32 %v65_v27, %v65_v27 }
  0x49   :  { %v90_v9 = vsel %vm366_vm1, %v87_v52, %v84_v60  ;;  %v126_v16 = vmul.f32 0.6931472, %v212_v8  ;;  %v214_v21 = vpop.eup %213 }
  0x4a   :  { %v100_v15 = vadd.f32 %v90_v9, %v68_v45  ;;  %v99_v17 = vsel %vm377_vm4, %v96_v62, %v93_v13  ;;  %v135_v28 = vmul.f32 0.6931472, %v214_v21  ;;  %v161_v48 = vmul.f32 %v159_v41, %v157_v40 }
  0x4b   :  { %v132_v23 = vsel %vm373_vm3, %v129_v1, %v126_v16  ;;  %v101_v24 = vadd.f32 %v99_v17, %v69_v55 }
  0x4c   :  { %v102_v22 = vsel %vm70_vm0, %v337_v3, %v100_v15  ;;  %v142_v26 = vadd.f32 %v132_v23, %v110_v61  ;;  %v141_v35 = vsel %vm140_vm6, %v138_v19, %v135_v28 }
  0x4d   :  { %v104_v25 = vsub.f32 0.0, %v102_v22  ;;  %v103_v31 = vsel %vm71_vm2, %v339_v5, %v101_v24  ;;  %v143_v39 = vadd.f32 %v141_v35, %v111_v18  ;;  %v160_v5 = vmul.f32 %v158_v30, %v156_v29 }
  0x4e   :  { %v144_v3 = vsel %vm112_vm5, %v343_v7, %v142_v26  ;;  %v105_v34 = vsub.f32 0.0, %v103_v31 }
  0x4f   :  { %v106_v36 = vmul.f32 %v104_v25, %v351_v32  ;;  %v146_v37 = vsub.f32 0.0, %v144_v3  ;;  %v145_v43 = vsel %vm113_vm7, %v347_v10, %v143_v39 }
  0x50   :  { %v107_v45 = vmul.f32 %v105_v34, %v353_v33  ;;  %v147_v7 = vsub.f32 0.0, %v145_v43 }
  0x51   :  { %v148_v42 = vmul.f32 %v146_v37, %v60_v38 }
  0x52   :  { %v149_v47 = vmul.f32 %v147_v7, %v61_v44 }
  0x53   :  { %v150_v46 = vadd.f32 %v148_v42, %v106_v36 }
  0x54   :  { %v151_v50 = vadd.f32 %v149_v47, %v107_v45 }
  0x55   :  { %v162_v49 = vmul.f32 %v160_v5, %v150_v46 }
  0x56   :  { %v163_v51 = vmul.f32 %v161_v48, %v151_v50 }
  0x57   :  { %164 = vst [vmem:[#allocation7] sm:$0xff] %v162_v49 }
  0x58   :  { %165 = vst [vmem:[#allocation7 + $0x8] sm:$0xff] %v163_v51 }
  0x59   :  { %270 = shalt.err (!%p267_p6)
}
  0x5a   :  { %s271_s10 = scalar_lea.hbm %s431_s2, 256 }
  0x5b   :  { %p272_p7 = scmp.ne.s32.totalorder %s431_s2, %s271_s10  ;;  %p275_p8 = scmp.lt.u32.totalorder %s271_s10, %s431_s2 }
  0x5d   :  { %p277_p9 = pnand %p275_p8, %p272_p7 }
  0x5f   :  { %280 = shalt.err (!%p277_p9)
}
  0x60   :  { %177 = dma.vmem_to_hbm [thread:$0]  %s172_s6, 256, %s431_s2, [#allocation4], %s288_s19, %s288_s19, %s289_s20  }
  0x61   :  { %285 = dma.done.wait [#allocation4], 256  }
  0x62   :  { %286 = vsyncadd [#allocation4], 4294967040 }
  0x63   :  { %181 = vsyncpa [#allocation3], 1 }
  0x64   :  { %182 = vsyncpa [#allocation6], 1 }
  0x65   :  { %183 = vsyncpa [#allocation4], 1 }

</bundles_post_ra>
